<compile_context>
chip_gen: v7x
topology: tpu7x:2x2x1
jax: 0.10.0
libtpu: 0.0.40
codegen_flags: <defaults>
</compile_context>

<pallas_src>
import jax
import jax.numpy as jnp
from jax.experimental import pallas as pl
from jax.experimental.pallas import tpu as pltpu

# ----------------------------- small, deterministic hyper-params ------------
INPUT_VOCAB = 50      # decoder-input vocab (nn.Embedding rows)
EMB = 32              # embedding_size
HID = 32              # hidden_size
OUT_VOCAB = 128       # output_size = len(trg.vocab); 128 keeps the FC store lane-dense
NUM_LAYERS = 2
BATCH = 8
SEQ_T = 6             # number of fused decode steps in the demo
DROPOUT_P = 0.5       # nn.Dropout is identity in eval mode


# ----------------------------- fused Pallas kernel ---------------------------
def _decoder_kernel(tok_ref,             # SMEM (T, N) int32 (scalar prefetch)
                    emb_ref,             # (V, E)
                    w0_ref, b0_ref,      # (E+H, 4H), (1, 4H)  g-cols pre-scaled x2
                    w1_ref, b1_ref,      # (2H, 4H),  (1, 4H)
                    fc_w_ref, fc_b_ref,  # (H, OUT),  (1, OUT)
                    state_in_ref,        # (N, 4H) packed [h0|h1|c0|c1]
                    pred_ref,            # (1, N, OUT)
                    state_out_ref,       # (N, 4H) packed [h0|h1|c0|c1]
                    state_scr):          # VMEM scratch (N, 4H), persists across steps
    t = pl.program_id(0)

    @pl.when(t == 0)
    def _():
        state_scr[...] = state_in_ref[...]

    # ---- embedding gather as one-hot @ table on the (otherwise idle) MXU ----
    lane_ids = jax.lax.broadcasted_iota(jnp.int32, (BATCH, INPUT_VOCAB), 1)
    sub_ids = jax.lax.broadcasted_iota(jnp.int32, (BATCH, INPUT_VOCAB), 0)
    onehot = jnp.zeros((BATCH, INPUT_VOCAB), jnp.float32)
    for i in range(BATCH):
        onehot = jnp.where((sub_ids == i) & (lane_ids == tok_ref[t, i]), 1.0, onehot)
    x = jnp.dot(onehot, emb_ref[...], preferred_element_type=jnp.float32)   # (N, E)
    # nn.Dropout on the embedding is identity in eval mode.

    state = state_scr[...]                                                  # (N, 4H)
    h0_prev = state[:, 0 * HID:1 * HID]
    h1_prev = state[:, 1 * HID:2 * HID]
    c0_prev = state[:, 2 * HID:3 * HID]
    c1_prev = state[:, 3 * HID:4 * HID]

    def lstm_layer(inp, h_prev, c_prev, w_ref, b_ref):
        # single fused lane-dense (N, 4H) gate slab; PyTorch gate order i,f,g,o
        xh = jnp.concatenate([inp, h_prev], axis=1)                         # (N, in+H)
        gates = jnp.dot(xh, w_ref[...],
                        preferred_element_type=jnp.float32) + b_ref[...]
        sg = jax.nn.sigmoid(gates)          # ONE full-slab EUP pass
        i_g = sg[:, 0 * HID:1 * HID]
        f_g = sg[:, 1 * HID:2 * HID]
        g_g = 2.0 * sg[:, 2 * HID:3 * HID] - 1.0   # tanh(g) = 2*sigmoid(2g) - 1
        o_g = sg[:, 3 * HID:4 * HID]
        c_new = f_g * c_prev + i_g * g_g
        h_new = o_g * jnp.tanh(c_new)
        return h_new, c_new

    h0, c0 = lstm_layer(x, h0_prev, c0_prev, w0_ref, b0_ref)
    # nn.LSTM inter-layer dropout is identity in eval mode.
    h1, c1 = lstm_layer(h0, h1_prev, c1_prev, w1_ref, b1_ref)

    # output projection (lane-dense OUT = 128), one (1, N, OUT) block per step
    pred_ref[0, :, :] = (jnp.dot(h1, fc_w_ref[...],
                                 preferred_element_type=jnp.float32) + fc_b_ref[...])

    # carry recurrent state in VMEM scratch; write back once at the last step
    state_scr[...] = jnp.concatenate([h0, h1, c0, c1], axis=1)

    @pl.when(t == pl.num_programs(0) - 1)
    def _():
        state_out_ref[...] = state_scr[...]


# ----------------------------- wrapper ---------------------------------------
def _build_pallas_call(T):
    const2 = lambda t, tok: (0, 0)
    grid_spec = pltpu.PrefetchScalarGridSpec(
        num_scalar_prefetch=1,            # tokens (T, N) -> SMEM
        grid=(T,),
        in_specs=[
            pl.BlockSpec((INPUT_VOCAB, EMB), const2),        # embedding table (V, E)
            pl.BlockSpec((EMB + HID, 4 * HID), const2),      # fused W layer 0
            pl.BlockSpec((1, 4 * HID), const2),              # b0
            pl.BlockSpec((2 * HID, 4 * HID), const2),        # fused W layer 1
            pl.BlockSpec((1, 4 * HID), const2),              # b1
            pl.BlockSpec((HID, OUT_VOCAB), const2),          # fc_w
            pl.BlockSpec((1, OUT_VOCAB), const2),            # fc_b
            pl.BlockSpec((BATCH, 4 * HID), const2),          # packed state in (8,128)
        ],
        out_specs=(
            pl.BlockSpec((1, BATCH, OUT_VOCAB), lambda t, tok: (t, 0, 0)),  # preds
            pl.BlockSpec((BATCH, 4 * HID), const2),                         # state out
        ),
        scratch_shapes=[pltpu.VMEM((BATCH, 4 * HID), jnp.float32)],
    )
    return pl.pallas_call(
        _decoder_kernel,
        out_shape=(
            jax.ShapeDtypeStruct((T, BATCH, OUT_VOCAB), jnp.float32),
            jax.ShapeDtypeStruct((BATCH, 4 * HID), jnp.float32),
        ),
        grid_spec=grid_spec,
        compiler_params=pltpu.CompilerParams(dimension_semantics=("arbitrary",)),
    )


@jax.jit
def decoder_forward_seq(prep, tokens, hidden, cell):
    """Run T teacher-forced decode steps in ONE pallas_call (fused time loop)."""
    T = tokens.shape[0]
    # pack (L, N, H) h/c into one lane-dense (N, 4H) slab: [h0 | h1 | c0 | c1]
    state_in = jnp.concatenate([hidden[0], hidden[1], cell[0], cell[1]], axis=1)
    preds, state_out = _build_pallas_call(T)(
        tokens, prep["emb"],
        prep["w0"], prep["b0"], prep["w1"], prep["b1"],
        prep["fc_w"], prep["fc_b"], state_in)
    hidden_out = jnp.stack([state_out[:, 0 * HID:1 * HID],
                            state_out[:, 1 * HID:2 * HID]])
    cell_out = jnp.stack([state_out[:, 2 * HID:3 * HID],
                          state_out[:, 3 * HID:4 * HID]])
    return preds, hidden_out, cell_out


@jax.jit
def decoder_forward(prep, x_tokens, hidden, cell):
    """Exact Decoder.forward(x, hidden, cell) semantics (one step, eval mode)."""
    preds, h, c = decoder_forward_seq(prep, x_tokens[None, :], hidden, cell)
    return preds[0], h, c


# ----------------------------- parameter init / prep -------------------------
def init_params(key):
    """Canonical (PyTorch-equivalent) parameter layout."""
    ks = jax.random.split(key, 9)

    def rnd(k, shape):
        return 0.1 * jax.random.normal(k, shape, jnp.float32)

    return {
        "embedding": rnd(ks[0], (INPUT_VOCAB, EMB)),
        "w_ih0": rnd(ks[1], (EMB, 4 * HID)),   # == weight_ih_l0^T
        "w_hh0": rnd(ks[2], (HID, 4 * HID)),   # == weight_hh_l0^T
        "b0":    rnd(ks[3], (1, 4 * HID)),     # == bias_ih_l0 + bias_hh_l0
        "w_ih1": rnd(ks[4], (HID, 4 * HID)),
        "w_hh1": rnd(ks[5], (HID, 4 * HID)),
        "b1":    rnd(ks[6], (1, 4 * HID)),
        "fc_w":  rnd(ks[7], (HID, OUT_VOCAB)),  # == fc.weight^T
        "fc_b":  rnd(ks[8], (1, OUT_VOCAB)),
    }


def prepare_params(params):
    """One-time wrapper-side repack into the fused kernel layout.
    [W_ih; W_hh] concatenated, and the g-gate columns scaled by 2 so the kernel
    can recover tanh(g) = 2*sigmoid(2g) - 1 from a single sigmoid slab."""
    g_scale = jnp.ones((1, 4 * HID), jnp.float32).at[:, 2 * HID:3 * HID].set(2.0)

    def fuse(w_ih, w_hh, b):
        w = jnp.concatenate([w_ih, w_hh], axis=0)   # (in + H, 4H)
        return w * g_scale, b * g_scale

    w0, b0 = fuse(params["w_ih0"], params["w_hh0"], params["b0"])
    w1, b1 = fuse(params["w_ih1"], params["w_hh1"], params["b1"])
    return {
        "emb": params["embedding"],
        "w0": w0, "b0": b0,
        "w1": w1, "b1": b1,
        "fc_w": params["fc_w"], "fc_b": params["fc_b"],
    }


# ----------------------------- pure-JAX reference ----------------------------
def decoder_step_ref(params, x_tokens, hidden, cell):
    emb = jnp.take(params["embedding"], x_tokens, axis=0)

    def step(inp, h, c, w_ih, w_hh, b):
        gates = inp @ w_ih + h @ w_hh + b
        i_g = jax.nn.sigmoid(gates[:, 0 * HID:1 * HID])
        f_g = jax.nn.sigmoid(gates[:, 1 * HID:2 * HID])
        g_g = jnp.tanh(gates[:, 2 * HID:3 * HID])
        o_g = jax.nn.sigmoid(gates[:, 3 * HID:4 * HID])
        c_new = f_g * c + i_g * g_g
        h_new = o_g * jnp.tanh(c_new)
        return h_new, c_new

    h0, c0 = step(emb, hidden[0], cell[0], params["w_ih0"], params["w_hh0"], params["b0"])
    h1, c1 = step(h0, hidden[1], cell[1], params["w_ih1"], params["w_hh1"], params["b1"])
    preds = h1 @ params["fc_w"] + params["fc_b"]
    return preds, jnp.stack([h0, h1]), jnp.stack([c0, c1])


def decoder_seq_ref(params, tokens, hidden, cell):
    preds = []
    h, c = hidden, cell
    for t in range(tokens.shape[0]):
        p, h, c = decoder_step_ref(params, tokens[t], h, c)
        preds.append(p)
    return jnp.stack(preds), h, c


# ----------------------------- main -------------------------------------------
if __name__ == "__main__":
    key = jax.random.PRNGKey(0)
    k_params, k_tok, k_h, k_c = jax.random.split(key, 4)

    params = init_params(k_params)
    prep = prepare_params(params)

    tokens = jax.random.randint(k_tok, (SEQ_T, BATCH), 0, INPUT_VOCAB, dtype=jnp.int32)
    hidden = 0.1 * jax.random.normal(k_h, (NUM_LAYERS, BATCH, HID), jnp.float32)
    cell = 0.1 * jax.random.normal(k_c, (NUM_LAYERS, BATCH, HID), jnp.float32)

    # fused multi-step decode (timestep loop inside the kernel)
    preds_seq, h_seq, c_seq = decoder_forward_seq(prep, tokens, hidden, cell)
    jax.block_until_ready((preds_seq, h_seq, c_seq))

    # single-step path (exact Decoder.forward semantics)
    preds_1, h_1, c_1 = decoder_forward(prep, tokens[0], hidden, cell)
    jax.block_until_ready((preds_1, h_1, c_1))

    # correctness vs pure-JAX reference built from canonical (unfused) params
    preds_r, h_r, c_r = decoder_seq_ref(params, tokens, hidden, cell)
    p1_r, h1_r, c1_r = decoder_step_ref(params, tokens[0], hidden, cell)

    assert preds_seq.shape == (SEQ_T, BATCH, OUT_VOCAB)
    assert h_seq.shape == (NUM_LAYERS, BATCH, HID)
    assert c_seq.shape == (NUM_LAYERS, BATCH, HID)
    assert preds_1.shape == (BATCH, OUT_VOCAB)

    def close(a, b, tol=1e-4):
        return bool(jnp.max(jnp.abs(a - b)) < tol)

    assert close(preds_seq, preds_r), float(jnp.max(jnp.abs(preds_seq - preds_r)))
    assert close(h_seq, h_r), float(jnp.max(jnp.abs(h_seq - h_r)))
    assert close(c_seq, c_r), float(jnp.max(jnp.abs(c_seq - c_r)))
    assert close(preds_1, p1_r)
    assert close(h_1, h1_r)
    assert close(c_1, c1_r)

    print("KERNEL_OK")
</pallas_src>

<mosaic_0001>
module attributes {stable_mosaic.version = 11 : i64} {
  func.func @_decoder_kernel(%arg0: i32, %arg1: memref<6x8xi32, #tpu.memory_space<smem>>, %arg2: memref<50x32xf32, #tpu.memory_space<vmem>>, %arg3: memref<64x128xf32, #tpu.memory_space<vmem>>, %arg4: memref<1x128xf32, #tpu.memory_space<vmem>>, %arg5: memref<64x128xf32, #tpu.memory_space<vmem>>, %arg6: memref<1x128xf32, #tpu.memory_space<vmem>>, %arg7: memref<32x128xf32, #tpu.memory_space<vmem>>, %arg8: memref<1x128xf32, #tpu.memory_space<vmem>>, %arg9: memref<8x128xf32, #tpu.memory_space<vmem>>, %arg10: memref<1x8x128xf32, #tpu.memory_space<vmem>>, %arg11: memref<8x128xf32, #tpu.memory_space<vmem>>, %arg12: memref<8x128xf32, #tpu.memory_space<vmem>>) attributes {dimension_semantics = [#tpu.dimension_semantics<arbitrary>], iteration_bounds = array<i64: 6>, scalar_prefetch = 1 : i64, scratch_operands = 1 : i64, tpu.core_type = #tpu.core_type<tc>, window_params = [{pipeline_mode = #tpu.pipeline_mode<synchronous>, transform_indices = @transform_0, window_bounds = array<i64: 50, 32>}, {pipeline_mode = #tpu.pipeline_mode<synchronous>, transform_indices = @transform_1, window_bounds = array<i64: 64, 128>}, {pipeline_mode = #tpu.pipeline_mode<synchronous>, transform_indices = @transform_2, window_bounds = array<i64: 1, 128>}, {pipeline_mode = #tpu.pipeline_mode<synchronous>, transform_indices = @transform_3, window_bounds = array<i64: 64, 128>}, {pipeline_mode = #tpu.pipeline_mode<synchronous>, transform_indices = @transform_4, window_bounds = array<i64: 1, 128>}, {pipeline_mode = #tpu.pipeline_mode<synchronous>, transform_indices = @transform_5, window_bounds = array<i64: 32, 128>}, {pipeline_mode = #tpu.pipeline_mode<synchronous>, transform_indices = @transform_6, window_bounds = array<i64: 1, 128>}, {pipeline_mode = #tpu.pipeline_mode<synchronous>, transform_indices = @transform_7, window_bounds = array<i64: 8, 128>}, {transform_indices = @transform_8, window_bounds = array<i64: 1, 8, 128>}, {pipeline_mode = #tpu.pipeline_mode<synchronous>, transform_indices = @transform_9, window_bounds = array<i64: 8, 128>}]} {
    %c0_i32 = arith.constant 0 : i32
    %0 = arith.cmpi eq, %arg0, %c0_i32 : i32
    %1 = arith.extui %0 : i1 to i32
    %c0_i32_0 = arith.constant 0 : i32
    %2 = arith.cmpi ne, %1, %c0_i32_0 : i32
    scf.if %2 {
      %c0_43 = arith.constant 0 : index
      %c0_44 = arith.constant 0 : index
      %146 = vector.load %arg9[%c0_43, %c0_44] : memref<8x128xf32, #tpu.memory_space<vmem>>, vector<8x128xf32>
      %c0_45 = arith.constant 0 : index
      %c0_46 = arith.constant 0 : index
      %147 = vector.load %arg12[%c0_45, %c0_46] : memref<8x128xf32, #tpu.memory_space<vmem>>, vector<8x128xf32>
      tpu.vector_store %arg12[%c0_45, %c0_46], %146 {strides = array<i32>} : memref<8x128xf32, #tpu.memory_space<vmem>>, vector<8x128xf32>,
    } else {
    }
    %3 = tpu.iota {dimensions = array<i32: 1>} : vector<8x50xi32>
    %4 = tpu.iota {dimensions = array<i32: 0>} : vector<8x50xi32>
    %cst = arith.constant 0.000000e+00 : f32
    %5 = vector.broadcast %cst : f32 to vector<8x50xf32>
    %c0_i32_1 = arith.constant 0 : i32
    %6 = vector.broadcast %c0_i32_1 : i32 to vector<8x50xi32>
    %7 = arith.cmpi eq, %4, %6 : vector<8x50xi32>
    %8 = arith.index_cast %arg0 : i32 to index
    %c0 = arith.constant 0 : index
    %9 = memref.load %arg1[%8, %c0] : memref<6x8xi32, #tpu.memory_space<smem>>
    %10 = vector.broadcast %9 : i32 to vector<8x50xi32>
    %11 = arith.cmpi eq, %3, %10 : vector<8x50xi32>
    %12 = arith.andi %7, %11 : vector<8x50xi1>
    %cst_2 = arith.constant 1.000000e+00 : f32
    %13 = vector.broadcast %cst_2 : f32 to vector<8x50xf32>
    %14 = arith.select %12, %13, %5 : vector<8x50xi1>, vector<8x50xf32>
    %c1_i32 = arith.constant 1 : i32
    %15 = vector.broadcast %c1_i32 : i32 to vector<8x50xi32>
    %16 = arith.cmpi eq, %4, %15 : vector<8x50xi32>
    %17 = arith.index_cast %arg0 : i32 to index
    %c1 = arith.constant 1 : index
    %18 = memref.load %arg1[%17, %c1] : memref<6x8xi32, #tpu.memory_space<smem>>
    %19 = vector.broadcast %18 : i32 to vector<8x50xi32>
    %20 = arith.cmpi eq, %3, %19 : vector<8x50xi32>
    %21 = arith.andi %16, %20 : vector<8x50xi1>
    %cst_3 = arith.constant 1.000000e+00 : f32
    %22 = vector.broadcast %cst_3 : f32 to vector<8x50xf32>
    %23 = arith.select %21, %22, %14 : vector<8x50xi1>, vector<8x50xf32>
    %c2_i32 = arith.constant 2 : i32
    %24 = vector.broadcast %c2_i32 : i32 to vector<8x50xi32>
    %25 = arith.cmpi eq, %4, %24 : vector<8x50xi32>
    %26 = arith.index_cast %arg0 : i32 to index
    %c2 = arith.constant 2 : index
    %27 = memref.load %arg1[%26, %c2] : memref<6x8xi32, #tpu.memory_space<smem>>
    %28 = vector.broadcast %27 : i32 to vector<8x50xi32>
    %29 = arith.cmpi eq, %3, %28 : vector<8x50xi32>
    %30 = arith.andi %25, %29 : vector<8x50xi1>
    %cst_4 = arith.constant 1.000000e+00 : f32
    %31 = vector.broadcast %cst_4 : f32 to vector<8x50xf32>
    %32 = arith.select %30, %31, %23 : vector<8x50xi1>, vector<8x50xf32>
    %c3_i32 = arith.constant 3 : i32
    %33 = vector.broadcast %c3_i32 : i32 to vector<8x50xi32>
    %34 = arith.cmpi eq, %4, %33 : vector<8x50xi32>
    %35 = arith.index_cast %arg0 : i32 to index
    %c3 = arith.constant 3 : index
    %36 = memref.load %arg1[%35, %c3] : memref<6x8xi32, #tpu.memory_space<smem>>
    %37 = vector.broadcast %36 : i32 to vector<8x50xi32>
    %38 = arith.cmpi eq, %3, %37 : vector<8x50xi32>
    %39 = arith.andi %34, %38 : vector<8x50xi1>
    %cst_5 = arith.constant 1.000000e+00 : f32
    %40 = vector.broadcast %cst_5 : f32 to vector<8x50xf32>
    %41 = arith.select %39, %40, %32 : vector<8x50xi1>, vector<8x50xf32>
    %c4_i32 = arith.constant 4 : i32
    %42 = vector.broadcast %c4_i32 : i32 to vector<8x50xi32>
    %43 = arith.cmpi eq, %4, %42 : vector<8x50xi32>
    %44 = arith.index_cast %arg0 : i32 to index
    %c4 = arith.constant 4 : index
    %45 = memref.load %arg1[%44, %c4] : memref<6x8xi32, #tpu.memory_space<smem>>
    %46 = vector.broadcast %45 : i32 to vector<8x50xi32>
    %47 = arith.cmpi eq, %3, %46 : vector<8x50xi32>
    %48 = arith.andi %43, %47 : vector<8x50xi1>
    %cst_6 = arith.constant 1.000000e+00 : f32
    %49 = vector.broadcast %cst_6 : f32 to vector<8x50xf32>
    %50 = arith.select %48, %49, %41 : vector<8x50xi1>, vector<8x50xf32>
    %c5_i32 = arith.constant 5 : i32
    %51 = vector.broadcast %c5_i32 : i32 to vector<8x50xi32>
    %52 = arith.cmpi eq, %4, %51 : vector<8x50xi32>
    %53 = arith.index_cast %arg0 : i32 to index
    %c5 = arith.constant 5 : index
    %54 = memref.load %arg1[%53, %c5] : memref<6x8xi32, #tpu.memory_space<smem>>
    %55 = vector.broadcast %54 : i32 to vector<8x50xi32>
    %56 = arith.cmpi eq, %3, %55 : vector<8x50xi32>
    %57 = arith.andi %52, %56 : vector<8x50xi1>
    %cst_7 = arith.constant 1.000000e+00 : f32
    %58 = vector.broadcast %cst_7 : f32 to vector<8x50xf32>
    %59 = arith.select %57, %58, %50 : vector<8x50xi1>, vector<8x50xf32>
    %c6_i32 = arith.constant 6 : i32
    %60 = vector.broadcast %c6_i32 : i32 to vector<8x50xi32>
    %61 = arith.cmpi eq, %4, %60 : vector<8x50xi32>
    %62 = arith.index_cast %arg0 : i32 to index
    %c6 = arith.constant 6 : index
    %63 = memref.load %arg1[%62, %c6] : memref<6x8xi32, #tpu.memory_space<smem>>
    %64 = vector.broadcast %63 : i32 to vector<8x50xi32>
    %65 = arith.cmpi eq, %3, %64 : vector<8x50xi32>
    %66 = arith.andi %61, %65 : vector<8x50xi1>
    %cst_8 = arith.constant 1.000000e+00 : f32
    %67 = vector.broadcast %cst_8 : f32 to vector<8x50xf32>
    %68 = arith.select %66, %67, %59 : vector<8x50xi1>, vector<8x50xf32>
    %c7_i32 = arith.constant 7 : i32
    %69 = vector.broadcast %c7_i32 : i32 to vector<8x50xi32>
    %70 = arith.cmpi eq, %4, %69 : vector<8x50xi32>
    %71 = arith.index_cast %arg0 : i32 to index
    %c7 = arith.constant 7 : index
    %72 = memref.load %arg1[%71, %c7] : memref<6x8xi32, #tpu.memory_space<smem>>
    %73 = vector.broadcast %72 : i32 to vector<8x50xi32>
    %74 = arith.cmpi eq, %3, %73 : vector<8x50xi32>
    %75 = arith.andi %70, %74 : vector<8x50xi1>
    %cst_9 = arith.constant 1.000000e+00 : f32
    %76 = vector.broadcast %cst_9 : f32 to vector<8x50xf32>
    %77 = arith.select %75, %76, %68 : vector<8x50xi1>, vector<8x50xf32>
    %c0_10 = arith.constant 0 : index
    %c0_11 = arith.constant 0 : index
    %78 = vector.load %arg2[%c0_10, %c0_11] : memref<50x32xf32, #tpu.memory_space<vmem>>, vector<50x32xf32>
    %cst_12 = arith.constant dense<0.000000e+00> : vector<8x32xf32>
    %79 = tpu.matmul %77, %78, %cst_12 {dimension_numbers = #tpu.dot_dimension_numbers<[1], [0], [0], [1], [0, 0, 1, 1], [], []>} : vector<8x50xf32>, vector<50x32xf32>, vector<8x32xf32> -> vector<8x32xf32>
    %c0_13 = arith.constant 0 : index
    %c0_14 = arith.constant 0 : index
    %80 = vector.load %arg12[%c0_13, %c0_14] : memref<8x128xf32, #tpu.memory_space<vmem>>, vector<8x128xf32>
    %81 = vector.extract_strided_slice %80 {offsets = [0, 0], sizes = [8, 32], strides = [1, 1]} : vector<8x128xf32> to vector<8x32xf32>
    %82 = vector.extract_strided_slice %80 {offsets = [0, 32], sizes = [8, 32], strides = [1, 1]} : vector<8x128xf32> to vector<8x32xf32>
    %83 = vector.extract_strided_slice %80 {offsets = [0, 64], sizes = [8, 32], strides = [1, 1]} : vector<8x128xf32> to vector<8x32xf32>
    %84 = vector.extract_strided_slice %80 {offsets = [0, 96], sizes = [8, 32], strides = [1, 1]} : vector<8x128xf32> to vector<8x32xf32>
    %85 = tpu.concatenate %79, %81 in 1 : vector<8x32xf32>, vector<8x32xf32> -> vector<8x64xf32>
    %c0_15 = arith.constant 0 : index
    %c0_16 = arith.constant 0 : index
    %86 = vector.load %arg3[%c0_15, %c0_16] : memref<64x128xf32, #tpu.memory_space<vmem>>, vector<64x128xf32>
    %cst_17 = arith.constant dense<0.000000e+00> : vector<8x128xf32>
    %87 = tpu.matmul %85, %86, %cst_17 {dimension_numbers = #tpu.dot_dimension_numbers<[1], [0], [0], [1], [0, 0, 1, 1], [], []>} : vector<8x64xf32>, vector<64x128xf32>, vector<8x128xf32> -> vector<8x128xf32>
    %c0_18 = arith.constant 0 : index
    %c0_19 = arith.constant 0 : index
    %88 = vector.load %arg4[%c0_18, %c0_19] : memref<1x128xf32, #tpu.memory_space<vmem>>, vector<1x128xf32>
    %89 = vector.broadcast %88 : vector<1x128xf32> to vector<8x128xf32>
    %90 = arith.addf %87, %89 : vector<8x128xf32>
    %91 = arith.negf %90 : vector<8x128xf32>
    %92 = math.exp %91 : vector<8x128xf32>
    %cst_20 = arith.constant 1.000000e+00 : f32
    %93 = vector.broadcast %cst_20 : f32 to vector<8x128xf32>
    %94 = arith.addf %93, %92 : vector<8x128xf32>
    %95 = arith.divf %93, %94 : vector<8x128xf32>
    %96 = vector.extract_strided_slice %95 {offsets = [0, 0], sizes = [8, 32], strides = [1, 1]} : vector<8x128xf32> to vector<8x32xf32>
    %97 = vector.extract_strided_slice %95 {offsets = [0, 32], sizes = [8, 32], strides = [1, 1]} : vector<8x128xf32> to vector<8x32xf32>
    %98 = vector.extract_strided_slice %95 {offsets = [0, 64], sizes = [8, 32], strides = [1, 1]} : vector<8x128xf32> to vector<8x32xf32>
    %cst_21 = arith.constant 2.000000e+00 : f32
    %99 = vector.broadcast %cst_21 : f32 to vector<8x32xf32>
    %100 = arith.mulf %99, %98 : vector<8x32xf32>
    %cst_22 = arith.constant 1.000000e+00 : f32
    %101 = vector.broadcast %cst_22 : f32 to vector<8x32xf32>
    %102 = arith.subf %100, %101 : vector<8x32xf32>
    %103 = vector.extract_strided_slice %95 {offsets = [0, 96], sizes = [8, 32], strides = [1, 1]} : vector<8x128xf32> to vector<8x32xf32>
    %104 = arith.mulf %97, %83 : vector<8x32xf32>
    %105 = arith.mulf %96, %102 : vector<8x32xf32>
    %106 = arith.addf %104, %105 : vector<8x32xf32>
    %107 = math.tanh %106 : vector<8x32xf32>
    %108 = arith.mulf %103, %107 : vector<8x32xf32>
    %109 = tpu.concatenate %108, %82 in 1 : vector<8x32xf32>, vector<8x32xf32> -> vector<8x64xf32>
    %c0_23 = arith.constant 0 : index
    %c0_24 = arith.constant 0 : index
    %110 = vector.load %arg5[%c0_23, %c0_24] : memref<64x128xf32, #tpu.memory_space<vmem>>, vector<64x128xf32>
    %cst_25 = arith.constant dense<0.000000e+00> : vector<8x128xf32>
    %111 = tpu.matmul %109, %110, %cst_25 {dimension_numbers = #tpu.dot_dimension_numbers<[1], [0], [0], [1], [0, 0, 1, 1], [], []>} : vector<8x64xf32>, vector<64x128xf32>, vector<8x128xf32> -> vector<8x128xf32>
    %c0_26 = arith.constant 0 : index
    %c0_27 = arith.constant 0 : index
    %112 = vector.load %arg6[%c0_26, %c0_27] : memref<1x128xf32, #tpu.memory_space<vmem>>, vector<1x128xf32>
    %113 = vector.broadcast %112 : vector<1x128xf32> to vector<8x128xf32>
    %114 = arith.addf %111, %113 : vector<8x128xf32>
    %115 = arith.negf %114 : vector<8x128xf32>
    %116 = math.exp %115 : vector<8x128xf32>
    %cst_28 = arith.constant 1.000000e+00 : f32
    %117 = vector.broadcast %cst_28 : f32 to vector<8x128xf32>
    %118 = arith.addf %117, %116 : vector<8x128xf32>
    %119 = arith.divf %117, %118 : vector<8x128xf32>
    %120 = vector.extract_strided_slice %119 {offsets = [0, 0], sizes = [8, 32], strides = [1, 1]} : vector<8x128xf32> to vector<8x32xf32>
    %121 = vector.extract_strided_slice %119 {offsets = [0, 32], sizes = [8, 32], strides = [1, 1]} : vector<8x128xf32> to vector<8x32xf32>
    %122 = vector.extract_strided_slice %119 {offsets = [0, 64], sizes = [8, 32], strides = [1, 1]} : vector<8x128xf32> to vector<8x32xf32>
    %cst_29 = arith.constant 2.000000e+00 : f32
    %123 = vector.broadcast %cst_29 : f32 to vector<8x32xf32>
    %124 = arith.mulf %123, %122 : vector<8x32xf32>
    %cst_30 = arith.constant 1.000000e+00 : f32
    %125 = vector.broadcast %cst_30 : f32 to vector<8x32xf32>
    %126 = arith.subf %124, %125 : vector<8x32xf32>
    %127 = vector.extract_strided_slice %119 {offsets = [0, 96], sizes = [8, 32], strides = [1, 1]} : vector<8x128xf32> to vector<8x32xf32>
    %128 = arith.mulf %121, %84 : vector<8x32xf32>
    %129 = arith.mulf %120, %126 : vector<8x32xf32>
    %130 = arith.addf %128, %129 : vector<8x32xf32>
    %131 = math.tanh %130 : vector<8x32xf32>
    %132 = arith.mulf %127, %131 : vector<8x32xf32>
    %c0_31 = arith.constant 0 : index
    %c0_32 = arith.constant 0 : index
    %133 = vector.load %arg7[%c0_31, %c0_32] : memref<32x128xf32, #tpu.memory_space<vmem>>, vector<32x128xf32>
    %cst_33 = arith.constant dense<0.000000e+00> : vector<8x128xf32>
    %134 = tpu.matmul %132, %133, %cst_33 {dimension_numbers = #tpu.dot_dimension_numbers<[1], [0], [0], [1], [0, 0, 1, 1], [], []>} : vector<8x32xf32>, vector<32x128xf32>, vector<8x128xf32> -> vector<8x128xf32>
    %c0_34 = arith.constant 0 : index
    %c0_35 = arith.constant 0 : index
    %135 = vector.load %arg8[%c0_34, %c0_35] : memref<1x128xf32, #tpu.memory_space<vmem>>, vector<1x128xf32>
    %136 = vector.broadcast %135 : vector<1x128xf32> to vector<8x128xf32>
    %137 = arith.addf %134, %136 : vector<8x128xf32>
    %c0_36 = arith.constant 0 : index
    %c0_37 = arith.constant 0 : index
    %c0_38 = arith.constant 0 : index
    %138 = vector.load %arg10[%c0_36, %c0_37, %c0_38] : memref<1x8x128xf32, #tpu.memory_space<vmem>>, vector<1x8x128xf32>
    %139 = vector.shape_cast %138 : vector<1x8x128xf32> to vector<8x128xf32>
    %140 = vector.shape_cast %137 : vector<8x128xf32> to vector<1x8x128xf32>
    tpu.vector_store %arg10[%c0_36, %c0_37, %c0_38], %140 {strides = array<i32>} : memref<1x8x128xf32, #tpu.memory_space<vmem>>, vector<1x8x128xf32>,
    %141 = tpu.concatenate %108, %132, %106, %130 in 1 : vector<8x32xf32>, vector<8x32xf32>, vector<8x32xf32>, vector<8x32xf32> -> vector<8x128xf32>
    %c0_39 = arith.constant 0 : index
    %c0_40 = arith.constant 0 : index
    %142 = vector.load %arg12[%c0_39, %c0_40] : memref<8x128xf32, #tpu.memory_space<vmem>>, vector<8x128xf32>
    tpu.vector_store %arg12[%c0_39, %c0_40], %141 {strides = array<i32>} : memref<8x128xf32, #tpu.memory_space<vmem>>, vector<8x128xf32>,
    %c5_i32_41 = arith.constant 5 : i32
    %143 = arith.cmpi eq, %arg0, %c5_i32_41 : i32
    %144 = arith.extui %143 : i1 to i32
    %c0_i32_42 = arith.constant 0 : i32
    %145 = arith.cmpi ne, %144, %c0_i32_42 : i32
    scf.if %145 {
      %c0_43 = arith.constant 0 : index
      %c0_44 = arith.constant 0 : index
      %146 = vector.load %arg12[%c0_43, %c0_44] : memref<8x128xf32, #tpu.memory_space<vmem>>, vector<8x128xf32>
      %c0_45 = arith.constant 0 : index
      %c0_46 = arith.constant 0 : index
      %147 = vector.load %arg11[%c0_45, %c0_46] : memref<8x128xf32, #tpu.memory_space<vmem>>, vector<8x128xf32>
      tpu.vector_store %arg11[%c0_45, %c0_46], %146 {strides = array<i32>} : memref<8x128xf32, #tpu.memory_space<vmem>>, vector<8x128xf32>,
    } else {
    }
    return
  }
  func.func @transform_0(%arg0: i32, %arg1: memref<6x8xi32, #tpu.memory_space<smem>>) -> (i32, i32) {
    %c0_i32 = arith.constant 0 : i32
    %c0_i32_0 = arith.constant 0 : i32
    %c0_i32_1 = arith.constant 0 : i32
    return %c0_i32, %c0_i32_0 : i32, i32
  }
  func.func @transform_1(%arg0: i32, %arg1: memref<6x8xi32, #tpu.memory_space<smem>>) -> (i32, i32) {
    %c0_i32 = arith.constant 0 : i32
    %c0_i32_0 = arith.constant 0 : i32
    %c0_i32_1 = arith.constant 0 : i32
    return %c0_i32, %c0_i32_0 : i32, i32
  }
  func.func @transform_2(%arg0: i32, %arg1: memref<6x8xi32, #tpu.memory_space<smem>>) -> (i32, i32) {
    %c0_i32 = arith.constant 0 : i32
    %c0_i32_0 = arith.constant 0 : i32
    %c0_i32_1 = arith.constant 0 : i32
    return %c0_i32, %c0_i32_0 : i32, i32
  }
  func.func @transform_3(%arg0: i32, %arg1: memref<6x8xi32, #tpu.memory_space<smem>>) -> (i32, i32) {
    %c0_i32 = arith.constant 0 : i32
    %c0_i32_0 = arith.constant 0 : i32
    %c0_i32_1 = arith.constant 0 : i32
    return %c0_i32, %c0_i32_0 : i32, i32
  }
  func.func @transform_4(%arg0: i32, %arg1: memref<6x8xi32, #tpu.memory_space<smem>>) -> (i32, i32) {
    %c0_i32 = arith.constant 0 : i32
    %c0_i32_0 = arith.constant 0 : i32
    %c0_i32_1 = arith.constant 0 : i32
    return %c0_i32, %c0_i32_0 : i32, i32
  }
  func.func @transform_5(%arg0: i32, %arg1: memref<6x8xi32, #tpu.memory_space<smem>>) -> (i32, i32) {
    %c0_i32 = arith.constant 0 : i32
    %c0_i32_0 = arith.constant 0 : i32
    %c0_i32_1 = arith.constant 0 : i32
    return %c0_i32, %c0_i32_0 : i32, i32
  }
  func.func @transform_6(%arg0: i32, %arg1: memref<6x8xi32, #tpu.memory_space<smem>>) -> (i32, i32) {
    %c0_i32 = arith.constant 0 : i32
    %c0_i32_0 = arith.constant 0 : i32
    %c0_i32_1 = arith.constant 0 : i32
    return %c0_i32, %c0_i32_0 : i32, i32
  }
  func.func @transform_7(%arg0: i32, %arg1: memref<6x8xi32, #tpu.memory_space<smem>>) -> (i32, i32) {
    %c0_i32 = arith.constant 0 : i32
    %c0_i32_0 = arith.constant 0 : i32
    %c0_i32_1 = arith.constant 0 : i32
    return %c0_i32, %c0_i32_0 : i32, i32
  }
  func.func @transform_8(%arg0: i32, %arg1: memref<6x8xi32, #tpu.memory_space<smem>>) -> (i32, i32, i32) {
    %c0_i32 = arith.constant 0 : i32
    %c0_i32_0 = arith.constant 0 : i32
    %c0_i32_1 = arith.constant 0 : i32
    return %arg0, %c0_i32, %c0_i32_0 : i32, i32, i32
  }
  func.func @transform_9(%arg0: i32, %arg1: memref<6x8xi32, #tpu.memory_space<smem>>) -> (i32, i32) {
    %c0_i32 = arith.constant 0 : i32
    %c0_i32_0 = arith.constant 0 : i32
    %c0_i32_1 = arith.constant 0 : i32
    return %c0_i32, %c0_i32_0 : i32, i32
  }
}

</mosaic_0001>

<bundles_post_ra>
// kernel: decoder_forward_seq.1
= control target key start
LH: loop header
LB: loop body
LE: loop exit
PB: predicated region body
PF: predicated region fallthrough
CT: control target
= control target key end

     0   :  { %s1570_s0 = inlined_call_operand.vmem [shape: s32[6,8], index: 0, kind: input, shape index: {}]   ;;  %s1571_s1 = inlined_call_operand.vmem [shape: f32[50,32], index: 1, kind: input, shape index: {}]   ;;  %s1572_s2 = inlined_call_operand.vmem [shape: f32[64,128], index: 2, kind: input, shape index: {}]   ;;  %s1573_s3 = inlined_call_operand.vmem [shape: f32[1,128], index: 3, kind: input, shape index: {}]   ;;  %s1574_s4 = inlined_call_operand.vmem [shape: f32[64,128], index: 4, kind: input, shape index: {}]   ;;  %s1575_s5 = inlined_call_operand.vmem [shape: f32[1,128], index: 5, kind: input, shape index: {}]   ;;  %s1576_s6 = inlined_call_operand.vmem [shape: f32[32,128], index: 6, kind: input, shape index: {}]   ;;  %s1577_s7 = inlined_call_operand.vmem [shape: f32[1,128], index: 7, kind: input, shape index: {}]   ;;  %s1578_s8 = inlined_call_operand.vmem [shape: f32[8,128], index: 8, kind: input, shape index: {}]   ;;  %s1579_s9 = inlined_call_operand.hbm [shape: f32[6,8,128], index: 9, kind: output, shape index: {0}]   ;;  %s1580_s10 = inlined_call_operand.vmem [shape: f32[8,128], index: 10, kind: output, shape index: {1}]  }
   0x1   :  { %1583 = sst [smem:[#allocation11_spill]] %s1578_s8  ;;  %s16_s15 = sshll.u32 %s1570_s0, 4  ;;  %s17_s15 = int_to_ptr.vmem [resolvable:$true] %s16_s15 }
   0x2   :  { %s1105_s16 = scalar_lea.vmem %s17_s15, 128  ;;  %p1110_p1 = scmp.lt.s32.totalorder %s17_s15, %s17_s15 }
   0x3   :  { %p1106_p0 = scmp.ne.s32.totalorder %s17_s15, %s1105_s16  ;;  %p1111_p2 = scmp.lt.s32.totalorder %s1105_s16, %s1105_s16 }
   0x5   :  { %p1112_p3 = por %p1111_p2, %p1110_p1 }
   0x7   :  { %p1113_p4 = pnand %p1112_p3, %p1106_p0 }
   0x9   :  { %1116 = shalt.err (!%p1113_p4)  }
   0xa   :  { %s1183_s17 = smov [#allocation4]  }
   0xb   :  { %19 = dma.vmem_to_smem %s17_s15, 128, %s1183_s17, [#allocation3] }
   0xc   :  { %1161 = dma.done.wait [#allocation3], 128 }
   0xd   :  { %1162 = vsyncadd [#allocation3], 4294967168 }
   0xe   :  { %21 = sfence }
   0xf   :  { %22 = vsyncpa [#allocation6], 0 }
  0x10   :  { %24 = vsyncpa [#allocation6 + $0x1], 0  ;;  %s1249_s18 = smov 0   ;;  %s1251_s19 = smov 0  }
  0x11   :  { %s1253_s0 = smov 0   ;;  %s1255_s20 = smov 0  }
  0x12 LB: > { %1584 = sst [smem:[#allocation9_spill]] %s1177_s0  ;;  %s1270_s21 = sadd.s32 4294967295, %s1181_s20   ;;  %s1181_s20 = sphi %s1255_s20, %s1596_s20   ;;  %s1177_s0 = sphi %s1253_s0, %s1593_s0   ;;  %s1173_s19 = sphi %s1251_s19, %s1595_s19   ;;  %s1169_s18 = sphi %s1249_s18, %s1594_s18  }
  0x13   : > { %s888_s22 = sadd.s32 4294967294, %s1181_s20   ;;  %s1274_s23 = sadd.s32 1, %s1181_s20  }
  0x14   : > { %s205_s24 = sadd.s32 1, %s1177_s0  ;;  %s202_s25 = ssub.s32 %s1181_s20, %s1274_s23 }
  0x15   : > { %p215_p5 = scmp.ne.s32.totalorder %s1177_s0, %s1173_s19  ;;  %p203_p6 = scmp.eq.s32.totalorder %s202_s25, 0 }
  0x16   : > { %p216_p7 = scmp.eq.s32.totalorder %s1270_s21, 5  ;;  %p221_p8 = scmp.ne.s32.totalorder %s1173_s19, %s1169_s18 }
  0x17   : > { %p222_p9 = scmp.eq.s32.totalorder %s888_s22, 5  ;;  %p890_p12 = scmp.ge.s32.totalorder %s1181_s20, 1 }
  0x18   : > { %s1285_s26 = scalar_select %p203_p6, %s1177_s0, %s205_s24  }
  0x19   : > { %p1287_p10 = por %p216_p7, %p215_p5  ;;  %p1291_p11 = por %p222_p9, %p221_p8 }
  0x1a   : > { %1585 = sst [smem:[#allocation10_spill]] %s1285_s26  ;;  %p285_p13 = scmp.lt.s32.totalorder %s1181_s20, 7 }
  0x1c   : > { %p286_p0 = pnand %p890_p12, %p285_p13 }
  0x1d   : > { %s1581_s29 = sand.u32 (!%p286_p0), 1, %s1173_s19   ;;  %p892_p1 = scmp.ne.s32.totalorder (!%p286_p0), %s1270_s21, 0 }
  0x1e   : > { %289 = sbr.rel (%p286_p0) target bundleno = 1959 (0x7a7), region = 52  ;;  %s1300_s30 = sshll.u32 (!%p286_p0), %s1581_s29, 3 }
  0x25   : > { %319 = sbr.rel (%p892_p1) target bundleno = 45 (0x2d), region = 56  ;;  %s1588_s8 = sld [smem:[#allocation11_spill]] (!%p892_p1) }
  0x2b   : > { %v320_v0 = vld [vmem:[%s1588_s8] sm:$0xff] (!%p892_p1) }
  0x2c   : > { %321 = vst [vmem:[#allocation2] sm:$0xff] %v320_v0 }
  0x2d PF: > { %v382_v1 = vld [vmem:[%s1571_s1] sm:$0xff]  ;;  %v383_v2 = vld [vmem:[%s1571_s1 + $0x8] sm:$0xff]  ;;  %v384_v3 = vld [vmem:[%s1571_s1 + $0x10] sm:$0xff]  ;;  %v322_v4 = vlaneseq  ;;  %v1184_v5 = vmov 0.0|0.0   ;;  %s1321_s13 = sshll.u32 %s1270_s21, 7  ;;  %vm1185_vm0 = vmmov 0  }
  0x2e   : > { %1008 = vmatprep.subr.bf16.mxu0 %v1184_v5  ;;  %v1009_v6 = vpack.c.bf16 %v383_v2, %v382_v1  ;;  %v385_v7 = vld [vmem:[%s1571_s1 + $0x18] sm:$0xff]  ;;  %1017 = vmatprep.subr.bf16.mxu1 %v1184_v5  ;;  %v1186_v8 = vmov 0.0   ;;  %s1327_s14 = sld [smem:[#allocation4 + %s1321_s13]]  ;;  %s334_s15 = sadd.s32 1, %s1321_s13  ;;  %v474_v11 = vld [vmem:[%s1572_s2] sm:$0xff]  ;;  %v475_v12 = vld [vmem:[%s1572_s2 + $0x8] sm:$0xff] }
  0x2f   : > { %956 = vmatprep.mubr.msk.f32.mxu0 %vm1185_vm0, %v1186_v8  ;;  %975 = vmatprep.mubr.msk.f32.mxu1 %vm1185_vm0, %v1186_v8  ;;  %v1012_v9 = vpack.c.bf16 %v385_v7, %v384_v3  ;;  %v1332_v10 = vshrl.u32 %v322_v4, 7  ;;  %s1334_s16 = sld [smem:[#allocation4 + %s334_s15]]  ;;  %s341_s17 = sadd.s32 2, %s1321_s13  ;;  %v386_v13 = vld [vmem:[%s1571_s1 + $0x20] sm:$0xff]  ;;  %v387_v14 = vld [vmem:[%s1571_s1 + $0x28] sm:$0xff]  ;;  %v1353_v15 = vand.u32 127, %v322_v4  ;;  %v1018_v16 = vpack.c.bf16 %v475_v12, %v474_v11 }
  0x30   : > { %1010 = vmatpush3.bf16.msra.mxu0 %v1009_v6  ;;  %s1350_s15 = sld [smem:[#allocation4 + %s341_s17]]  ;;  %s348_s0 = sadd.s32 3, %s1321_s13  ;;  %v476_v17 = vld [vmem:[%s1572_s2 + $0x10] sm:$0xff]  ;;  %v477_v18 = vld [vmem:[%s1572_s2 + $0x18] sm:$0xff]  ;;  %v1015_v19 = vpack.c.bf16 %v387_v14, %v386_v13  ;;  %vm393_vm3 = vcmask 1041408   ;;  %v478_v24 = vld [vmem:[%s1572_s2 + $0x20] sm:$0xff] }
  0x31   : > { %1011 = vmatprep.subr.bf16.mxu0 %v1184_v5  ;;  %s1355_s22 = sld [smem:[#allocation4 + %s348_s0]]  ;;  %s355_s24 = sadd.s32 4, %s1321_s13  ;;  %vm326_vm1 = vcmp.eq.s32.totalorder %v1332_v10, 0  ;;  %vm333_vm2 = vcmp.eq.s32.totalorder %v1332_v10, 1  ;;  %1019 = vmatpush3.bf16.msra.mxu1 %v1018_v16  ;;  %v1021_v22 = vpack.c.bf16 %v477_v18, %v476_v17  ;;  %vm340_vm5 = vcmp.eq.s32.totalorder %v1332_v10, 2  ;;  %v479_v25 = vld [vmem:[%s1572_s2 + $0x28] sm:$0xff] }
  0x32   : > { %s1358_s25 = sld [smem:[#allocation4 + %s355_s24]]  ;;  %s362_s12 = sadd.s32 5, %s1321_s13  ;;  %1020 = vmatprep.subr.bf16.mxu1 %v1184_v5  ;;  %vm347_vm8 = vcmp.eq.s32.totalorder %v1332_v10, 3  ;;  %vm354_vm9 = vcmp.eq.s32.totalorder %v1332_v10, 4  ;;  %vm361_vm12 = vcmp.eq.s32.totalorder %v1332_v10, 5  ;;  %v1024_v32 = vpack.c.bf16 %v479_v25, %v478_v24  ;;  %v480_v35 = vld [vmem:[%s1572_s2 + $0x30] sm:$0xff] }
  0x33   : > { %s1368_s0 = sld [smem:[#allocation4 + %s362_s12]]  ;;  %s369_s17 = sadd.s32 6, %s1321_s13  ;;  %v1371_v20 = vld [vmem:[#allocation2] sm:$0xff]  ;;  %v388_v29 = vld [vmem:[%s1571_s1 + $0x30] sm:$0x3]  ;;  %v481_v36 = vld [vmem:[%s1572_s2 + $0x38] sm:$0xff] }
  0x34   : > { %1013 = vmatpush3.bf16.msra.mxu0 %v1012_v9  ;;  %v329_v21 = vstv %s1327_s14  ;;  %s1376_s24 = sld [smem:[#allocation4 + %s369_s17]]  ;;  %s376_s29 = sadd.s32 7, %s1321_s13  ;;  %v1027_v42 = vpack.c.bf16 %v481_v36, %v480_v35  ;;  %v896_v49 = vld [vmem:[%s1573_s3] ss:$0 sm:$0xff]  ;;  %v597_v2 = vld [vmem:[%s1574_s4 + $0x8] sm:$0xff]  ;;  %v598_v3 = vld [vmem:[%s1574_s4 + $0x10] sm:$0xff] }
  0x35   : > { %1014 = vmatprep.subr.bf16.mxu0 %v1184_v5  ;;  %vm330_vm4 = vcmp.eq.s32.totalorder %v1353_v15, %v329_v21  ;;  %v336_v23 = vstv %s1334_s16  ;;  %s1382_s12 = sld [smem:[#allocation4 + %s376_s29]]  ;;  %s1187_s16 = smov 32   ;;  %1022 = vmatpush3.bf16.msra.mxu1 %v1021_v22  ;;  %v596_v1 = vld [vmem:[%s1574_s4] sm:$0xff]  ;;  %v599_v6 = vld [vmem:[%s1574_s4 + $0x18] sm:$0xff]  ;;  %v601_v9 = vld [vmem:[%s1574_s4 + $0x28] sm:$0xff] }
  0x36   : > { %vm331_vm6 = vmand %vm326_vm1, %vm330_vm4  ;;  %vm337_vm7 = vcmp.eq.s32.totalorder %v1353_v15, %v336_v23  ;;  %v343_v26 = vstv %s1350_s15  ;;  %469 = vrot.lane.b32.xlu0 %v1371_v20, %s1187_s16  ;;  %1023 = vmatprep.subr.bf16.mxu1 %v1184_v5  ;;  %s1189_s11 = smov 64   ;;  %v1030_v4 = vpack.c.bf16 %v597_v2, %v596_v1  ;;  %v1033_v7 = vpack.c.bf16 %v599_v6, %v598_v3  ;;  %v602_v11 = vld [vmem:[%s1574_s4 + $0x30] sm:$0xff]  ;;  %v603_v12 = vld [vmem:[%s1574_s4 + $0x38] sm:$0xff]  ;;  %p906_p2 = scmp.ne.s32.totalorder %s1270_s21, 5 }
  0x37   : > { %v332_v27 = vsel %vm331_vm6, 1.0, %v1186_v8  ;;  %vm338_vm10 = vmand %vm333_vm2, %vm337_vm7  ;;  %vm344_vm11 = vcmp.eq.s32.totalorder %v1353_v15, %v343_v26  ;;  %v350_v28 = vstv %s1355_s22  ;;  %vm368_vm2 = vcmp.eq.s32.totalorder %v1332_v10, 6  ;;  %v712_v35 = vld [vmem:[%s1576_s6] sm:$0xff]  ;;  %v713_v36 = vld [vmem:[%s1576_s6 + $0x8] sm:$0xff] }
  0x38   : > { %1016 = vmatpush3.bf16.msra.mxu0 %v1015_v19  ;;  %v339_v30 = vsel %vm338_vm10, 1.0, %v332_v27  ;;  %vm345_vm13 = vmand %vm340_vm5, %vm344_vm11  ;;  %vm351_vm14 = vcmp.eq.s32.totalorder %v1353_v15, %v350_v28  ;;  %v357_v31 = vstv %s1358_s25  ;;  %vm375_vm6 = vcmp.eq.s32.totalorder %v1332_v10, 7  ;;  %v900_v19 = vld [vmem:[%s1575_s5] ss:$0 sm:$0xff] }
  0x39   : > { %954 = vmatprep.subr.mxu0 %v1186_v8  ;;  %v346_v33 = vsel %vm345_vm13, 1.0, %v339_v30  ;;  %vm352_vm15 = vmand %vm347_vm8, %vm351_vm14  ;;  %vm358_vm1 = vcmp.eq.s32.totalorder %v1353_v15, %v357_v31  ;;  %v364_v34 = vstv %s1368_s0  ;;  %vm389_vm11 = vcmask 408576   ;;  %1025 = vmatpush3.bf16.msra.mxu1 %v1024_v32  ;;  %s1188_s0 = smov 96  }
  0x3a   : > { %v353_v37 = vsel %vm352_vm15, 1.0, %v346_v33  ;;  %vm359_vm4 = vmand %vm354_vm9, %vm358_vm1  ;;  %vm365_vm5 = vcmp.eq.s32.totalorder %v1353_v15, %v364_v34  ;;  %v371_v38 = vstv %s1376_s24  ;;  %1026 = vmatprep.subr.bf16.mxu1 %v1184_v5  ;;  %571 = vrot.lane.b32.xlu1 %v1371_v20, %s1188_s0  ;;  %vm489_vm13 = vcmask 523264  }
  0x3b   : > { %v360_v39 = vsel %vm359_vm4, 1.0, %v353_v37  ;;  %vm366_vm7 = vmand %vm361_vm12, %vm365_vm5  ;;  %vm372_vm8 = vcmp.eq.s32.totalorder %v1353_v15, %v371_v38  ;;  %v378_v40 = vstv %s1382_s12  ;;  %vm472_vm12 = vcmask 261120   ;;  %v714_v37 = vld [vmem:[%s1576_s6 + $0x10] sm:$0xff] }
  0x3c   : > { %955 = vmatpush3.msk.msra.mxu0 %vm393_vm3, %v388_v29  ;;  %v367_v41 = vsel %vm366_vm7, 1.0, %v360_v39  ;;  %vm373_vm10 = vmand %vm368_vm2, %vm372_vm8  ;;  %vm379_vm9 = vcmp.eq.s32.totalorder %v1353_v15, %v378_v40  ;;  %v1039_v14 = vpack.c.bf16 %v603_v12, %v602_v11  ;;  %v1042_v38 = vpack.c.bf16 %v713_v36, %v712_v35  ;;  %v715_v39 = vld [vmem:[%s1576_s6 + $0x18] sm:$0xff] }
  0x3d   : > { %1029 = vmatprep.subr.bf16.mxu0 %v1184_v5  ;;  %v374_v43 = vsel %vm373_vm10, 1.0, %v367_v41  ;;  %vm380_vm3 = vmand %vm375_vm6, %vm379_vm9  ;;  %1028 = vmatpush3.bf16.msra.mxu1 %v1027_v42  ;;  %v1045_v40 = vpack.c.bf16 %v715_v39, %v714_v37 }
  0x3e   : > { %v381_v44 = vsel %vm380_vm3, 1.0, %v374_v43  ;;  %1041 = vmatprep.subr.bf16.mxu1 %v1184_v5 }
  0x3f   : > { %957 = vmatmul.mubr.msk.f32.vlgmr.msra.gmra.mrb[0].mxu0 %vm389_vm11, %v381_v44 }
  0x40   : > { %994 = vmatprep.mubr.msk.f32.mxu0 %vm1185_vm0, %v1186_v8  ;;  %1031 = vmatpush3.bf16.msra.mxu0 %v1030_v4 }
  0x41   : > { %1032 = vmatprep.subr.bf16.mxu0 %v1184_v5 }
  0x44   : > { %1034 = vmatpush3.bf16.msra.mxu0 %v1033_v7 }
  0x45   : > { %1035 = vmatprep.subr.bf16.mxu0 %v1184_v5 }
  0xa8   : > { %v470_v45 = vpop.permute.xlu0 %469 }
  0xac   : > { %v572_v61 = vpop.permute.xlu1 %571 }
 0x112   : > { %v463_v46 = vpop.f32.mrb[0].mxu0 }
 0x113   : > { %v473_v47 = vsel %vm472_vm12, %v463_v46, %v470_v45  ;;  %v958_v48 = vpop.f32.mrb[1].mxu0 }
 0x114   : > { %976 = vmatmul.mubr.msk.f32.vlgmr.msra.gmra.mrb[0].mxu1 %vm489_vm13, %v473_v47 }
 0x115   : > { %1005 = vmatprep.mubr.msk.f32.mxu1 %vm1185_vm0, %v1186_v8  ;;  %v600_v8 = vld [vmem:[%s1574_s4 + $0x20] sm:$0xff]  ;;  %1043 = vmatpush3.bf16.msra.mxu1 %v1042_v38  ;;  %vm812_vm0 = vcmask 785408  }
 0x116   : > { %v1036_v10 = vpack.c.bf16 %v601_v9, %v600_v8  ;;  %1044 = vmatprep.subr.bf16.mxu1 %v1184_v5 }
 0x118   : > { %1037 = vmatpush3.bf16.msra.mxu0 %v1036_v10 }
 0x119   : > { %1038 = vmatprep.subr.bf16.mxu0 %v1184_v5  ;;  %1046 = vmatpush3.bf16.msra.mxu1 %v1045_v40 }
 0x11c   : > { %1040 = vmatpush3.bf16.msra.mxu0 %v1039_v14 }
 0x1e7   : > { %v559_v50 = vpop.f32.mrb[0].mxu1 }
 0x1e8   : > { %v560_v51 = vadd.f32 %v896_v49, %v559_v50  ;;  %v977_v52 = vpop.f32.mrb[1].mxu1  ;;  %v904_v50 = vld [vmem:[%s1577_s7] ss:$0 sm:$0xff] }
 0x1ea   : > { %v898_v53 = vmul.f32 -1.442695, %v560_v51 }
 0x1ec   : > { %1093 = vpow2.f32 %v898_v53 }
 0x1f6   : > { %v1094_v54 = vpop.eup %1093 }
 0x1f7   : > { %v566_v55 = vadd.f32 1.0, %v1094_v54 }
 0x1f9   : > { %1095 = vrcp.f32 %v566_v55 }
 0x203   : > { %v1096_v56 = vpop.eup %1095 }
 0x204   : > { %v569_v57 = vmul.f32 2.0, %v1096_v56  ;;  %v574_v62 = vmul.f32 %v1096_v56, %v572_v61 }
 0x206   : > { %v899_v58 = vadd.f32 -1.0, %v569_v57 }
 0x208   : > { %576 = vrot.lane.b32.xlu0 %v899_v58, %s1189_s11 }
 0x27a   : > { %v577_v59 = vpop.permute.xlu0 %576 }
 0x27b   : > { %v579_v60 = vmul.f32 %v1096_v56, %v577_v59 }
 0x27d   : > { %581 = vrot.lane.b32.xlu1 %v579_v60, %s1187_s16 }
 0x2ef   : > { %v582_v63 = vpop.permute.xlu1 %581 }
 0x2f0   : > { %v1453_v0 = vadd.f32 %v582_v63, %v574_v62 }
 0x2f2   : > { %1097 = vtanh.f32 %v1453_v0 }
 0x2fc   : > { %v1098_v13 = vpop.eup %1097 }
 0x2fd   : > { %587 = vrot.lane.b32.xlu0 %v1098_v13, %s1189_s11 }
 0x36f   : > { %v588_v15 = vpop.permute.xlu0 %587 }
 0x370   : > { %v590_v16 = vmul.f32 %v1096_v56, %v588_v15 }
 0x372   : > { %592 = vrot.lane.b32.xlu1 %v590_v16, %s1187_s16 }
 0x376   : > { %692 = vrot.lane.b32.xlu1 %v1371_v20, %s1189_s11 }
 0x3e4   : > { %v593_v17 = vpop.permute.xlu1 %592 }
 0x3e5   : > { %v595_v18 = vsel %vm472_vm12, %v593_v17, %v1371_v20 }
 0x3e6   : > { %995 = vmatmul.mubr.msk.f32.vlgmr.msra.gmra.mrb[2].mxu0 %vm489_vm13, %v595_v18 }
 0x3e8   : > { %v693_v31 = vpop.permute.xlu1 %692 }
 0x4b9   : > { %v680_v21 = vpop.f32.mrb[2].mxu0 }
 0x4ba   : > { %v681_v22 = vadd.f32 %v900_v19, %v680_v21  ;;  %v996_v23 = vpop.f32.mrb[3].mxu0 }
 0x4bc   : > { %v902_v24 = vmul.f32 -1.442695, %v681_v22 }
 0x4be   : > { %1099 = vpow2.f32 %v902_v24 }
 0x4c8   : > { %v1100_v25 = vpop.eup %1099 }
 0x4c9   : > { %v687_v26 = vadd.f32 1.0, %v1100_v25 }
 0x4cb   : > { %1101 = vrcp.f32 %v687_v26 }
 0x4d5   : > { %v1102_v27 = vpop.eup %1101 }
 0x4d6   : > { %v690_v28 = vmul.f32 2.0, %v1102_v27  ;;  %v695_v32 = vmul.f32 %v1102_v27, %v693_v31 }
 0x4d8   : > { %v903_v29 = vadd.f32 -1.0, %v690_v28 }
 0x4da   : > { %697 = vrot.lane.b32.xlu0 %v903_v29, %s1189_s11 }
 0x54c   : > { %v698_v20 = vpop.permute.xlu0 %697 }
 0x54d   : > { %v700_v30 = vmul.f32 %v1102_v27, %v698_v20 }
 0x54f   : > { %702 = vrot.lane.b32.xlu0 %v700_v30, %s1187_s16 }
 0x5c1   : > { %v703_v33 = vpop.permute.xlu0 %702 }
 0x5c2   : > { %v705_v34 = vadd.f32 %v703_v33, %v695_v32 }
 0x5c4   : > { %1103 = vtanh.f32 %v705_v34 }
 0x5ce   : > { %v1104_v41 = vpop.eup %1103 }
 0x5cf   : > { %708 = vrot.lane.b32.xlu1 %v1104_v41, %s1189_s11 }
 0x641   : > { %v709_v42 = vpop.permute.xlu1 %708 }
 0x642   : > { %v711_v43 = vmul.f32 %v1102_v27, %v709_v42 }
 0x644   : > { %799 = vrot.lane.b32.xlu1 %v711_v43, %s1189_s11  ;;  %724 = vrot.lane.b32.xlu0 %v711_v43, %s1187_s16 }
 0x648   : > { %807 = vrot.lane.b32.xlu1 %v705_v34, %s1189_s11  ;;  %803 = vrot.lane.b32.xlu0 %v1453_v0, %s1187_s16  ;;  %s1589_s16 = scalar_lea.vmem [#allocation5], %s1300_s30 }
 0x6b6   : > { %v800_v44 = vpop.permute.xlu1 %799  ;;  %v725_v45 = vpop.permute.xlu0 %724 }
 0x6b7   : > { %1006 = vmatmul.mubr.msk.f32.vlgmr.msra.gmra.mrb[2].mxu1 %vm472_vm12, %v725_v45  ;;  %v810_v5 = vsel %vm472_vm12, %v593_v17, %v800_v44 }
 0x6ba   : > { %v808_v46 = vpop.permute.xlu1 %807  ;;  %v804_v47 = vpop.permute.xlu0 %803 }
 0x6bb   : > { %v811_v48 = vsel %vm489_vm13, %v810_v5, %v804_v47 }
 0x6bc   : > { %v813_v49 = vsel %vm812_vm0, %v811_v48, %v808_v46 }
 0x6bd   : > { %814 = vst [vmem:[#allocation2] sm:$0xff] %v813_v49 }
 0x6c4   : > { %v819_v54 = vld [vmem:[#allocation2] sm:$0xff] (!%p906_p2) }
 0x6c5   : > { %820 = vst [vmem:[%s1580_s10] sm:$0xff] (!%p906_p2), %v819_v54 }
 0x787   : > { %818 = sbr.rel (%p906_p2) target bundleno = 1934 (0x78e), region = 60 }
 0x78a   : > { %v794_v51 = vpop.f32.mrb[2].mxu1 }
 0x78b   : > { %v795_v52 = vadd.f32 %v904_v50, %v794_v51  ;;  %v1007_v53 = vpop.f32.mrb[3].mxu1 }
 0x78d   : > { %798 = vst [vmem:[%s1589_s16] sm:$0xff] %v795_v52 }
 0x78e PF: > { %s1530_s24 = scalar_lea.hbm %s1579_s9, %s1321_s13  ;;  %s1590_s12 = scalar_lea.vmem [#allocation5], %s1300_s30 }
 0x78f   : > { %s835_s8 = sshll.u32 %s1590_s12, 4  ;;  %s1591_s21 = sand.u32 1, %s1173_s19   ;;  %s836_s8 = int_to_ptr.vmem [resolvable:$true] %s835_s8 }
 0x790   : > { %s822_s26 = scalar_lea.sflag [#allocation6], %s1591_s21  ;;  %s1117_s15 = scalar_lea.vmem %s836_s8, 128 }
 0x791   : > { %p1118_p3 = scmp.ne.s32.totalorder %s836_s8, %s1117_s15  ;;  %s1190_s17 = smov [#allocation5]  }
 0x792   : > { %s1121_s22 = sshll.u32 %s1190_s17, 4  ;;  %s1122_s22 = int_to_ptr.vmem [resolvable:$false] %s1121_s22 }
 0x793   : > { %p1119_p4 = pnand %p1118_p3, %p1287_p10  ;;  %s1123_s29 = scalar_lea.vmem %s1122_s22, 256 }
 0x794   : > { %p1124_p6 = scmp.lt.s32.totalorder %s836_s8, %s1122_s22  ;;  %p1125_p7 = scmp.lt.s32.totalorder %s1123_s29, %s1117_s15 }
 0x795   : > { %p1120_p5 = pneg %p1119_p4 }
 0x796   : > { %p1126_p8 = por %p1125_p7, %p1124_p6 }
 0x798   : > { %p1127_p9 = pnand %p1126_p8, %p1120_p5 }
 0x79a   : > { %1130 = shalt.err (!%p1127_p9)
}
 0x79b   : > { %s1131_s30 = scalar_lea.hbm %s1530_s24, 128  ;;  %s1135_s11 = scalar_lea.hbm %s1579_s9, 768 }
 0x79c   : > { %p1132_p12 = scmp.ne.s32.totalorder %s1530_s24, %s1131_s30  ;;  %p1136_p1 = scmp.lt.u32.totalorder %s1530_s24, %s1579_s9 }
 0x79d   : > { %p1137_p2 = scmp.lt.u32.totalorder %s1135_s11, %s1131_s30  ;;  %p1139_p4 = scmp.lt.u32.totalorder %s1131_s30, %s1530_s24 }
 0x79e   : > { %p1133_p13 = pnand %p1132_p12, %p1287_p10 }
 0x79f   : > { %p1138_p3 = por %p1137_p2, %p1136_p1 }
 0x7a0   : > { %p1134_p0 = pneg %p1133_p13 }
 0x7a1   : > { %p1140_p5 = por %p1139_p4, %p1138_p3 }
 0x7a3   : > { %p1141_p6 = pnand %p1140_p5, %p1134_p0 }
 0x7a5   : > { %1144 = shalt.err (!%p1141_p6)
}
 0x7a6   : > { %1047 = dma.vmem_to_hbm [thread:$0]  (%p1287_p10), %s836_s8, 128, %s1530_s24, %s822_s26  }
 0x7a7 PF: > { %p1053_p7 = scmp.ge.s32.totalorder %s1181_s20, 2  ;;  %s853_s0 = sand.u32 1, %s1169_s18  }
 0x7a8   : > { %s854_s12 = scalar_lea.sflag [#allocation6], %s853_s0 }
 0x7a9   : > { %p1050_p8 = pnand %p1053_p7, %p1291_p11 }
 0x7ab   : > { %1164 = dma.done.wait (!%p1050_p8), %s854_s12, 128  }
 0x7ac   : > { %1166 = vsyncadd (!%p1050_p8), %s854_s12, 4294967168  ;;  %s1592_s21 = sld [smem:[#allocation9_spill]]  ;;  %s1593_s0 = sld [smem:[#allocation10_spill]] }
 0x7ad   : > { %p27_p9 = scmp.ge.s32.totalorder %s1274_s23, 8   ;;  %s1594_s18 = smov %s1173_s19 }
 0x7ae   : > { %s1596_s20 = smov %s1274_s23 }
 0x7af   :  { %29 = sbr.rel (!%p27_p9) target bundleno = 18 (0x12), region = 100 }
 0x7b2   : > { %s1595_s19 = smov %s1592_s21 }
 0x7b6   :  { %859 = vsyncpa [#allocation6], 1 }
 0x7b7   :  { %861 = vsyncpa [#allocation6 + $0x1], 1 }

</bundles_post_ra>
